<compile_context>
chip_gen: v7x
topology: tpu7x:2x2x1
jax: 0.10.0
libtpu: 0.0.40
codegen_flags: <defaults>
</compile_context>

<pallas_src>
import functools

import jax
import jax.numpy as jnp
from jax.experimental import pallas as pl
from jax.experimental.pallas import tpu as pltpu

HIDDEN = 20  # matches nn.Linear(2, 20) ... nn.Linear(20, 2) in the spec


def net_kernel(xT_ref, w2_ref, w3_ref, p_ref, w4f_ref, o_ref):
    # xT_ref : (2, Bt)     input tile, batch on lanes
    # w2_ref : (N, N)      fc2 weight (out, in) -- resident across grid steps
    # w3_ref : (N, N)      fc3 weight (out, in) -- resident across grid steps
    # p_ref  : (N, 5)      packed small params: [:,0:2]=w1  [:,2]=b1 [:,3]=b2 [:,4]=b3
    # w4f_ref: (1, N+1)    fused fc4 row: [:, :N]=w4[1]-w4[0], [:, N]=b4[1]-b4[0]
    # o_ref  : (2, Bt)     log-probs, classes on sublanes, batch on lanes
    xT = xT_ref[...]
    p = p_ref[...]
    w4f = w4f_ref[...]

    w1c0 = p[:, 0:1]           # (N, 1)
    w1c1 = p[:, 1:2]           # (N, 1)
    b1 = p[:, 2:3]             # (N, 1)
    b2 = p[:, 3:4]             # (N, 1)
    b3 = p[:, 4:5]             # (N, 1)
    wd = w4f[:, :-1]           # (1, N)  fused fc4 weight difference
    bd = w4f[:, -1:]           # (1, 1)  fused fc4 bias difference

    x0 = xT[0:1, :]            # (1, Bt)
    x1 = xT[1:2, :]            # (1, Bt)

    # fc1 (K=2): two broadcast FMAs on the VPU, no MXU.
    h1 = jnp.maximum(w1c0 * x0 + w1c1 * x1 + b1, 0.0)                  # (N, Bt)

    # fc2, fc3: 20x20 matmuls on the MXU, f32 accumulate.
    h2 = jnp.dot(w2_ref[...], h1, preferred_element_type=jnp.float32)
    h2 = jnp.maximum(h2 + b2, 0.0)                                     # (N, Bt)
    h3 = jnp.dot(w3_ref[...], h2, preferred_element_type=jnp.float32)
    h3 = jnp.maximum(h3 + b3, 0.0)                                     # (N, Bt)

    # fc4 (N=2) fused with log_softmax:
    #   d = logit1 - logit0 = (w4[1]-w4[0]) . h3 + (b4[1]-b4[0])
    #   log_softmax = [-softplus(d), d - softplus(d)]
    # d rides the otherwise-idle MXU (1x20xBt) instead of a VALU+XLU reduce.
    d = jnp.dot(wd, h3, preferred_element_type=jnp.float32) + bd       # (1, Bt)
    # numerically stable softplus(d) = max(d,0) + log(1 + exp(-|d|))
    sp = jnp.maximum(d, 0.0) + jnp.log(1.0 + jnp.exp(-jnp.abs(d)))     # (1, Bt)

    # Two direct lane-dense row stores (no sublane concatenate).
    o_ref[0:1, :] = -sp
    o_ref[1:2, :] = d - sp


def _choose_b_tile(B, cap=4096):
    """Lane-dense batch tile: multiple of 128, capped (VMEM-safe on v5e), and
    clamped so there are >=2 balanced tiles whenever possible (v7x: 2 TCs)."""
    Bp = pl.cdiv(B, 128) * 128             # batch rounded up to a lane multiple
    half = (Bp // 2) // 128 * 128          # largest tile still giving 2 tiles
    bt = half if half >= 128 else Bp
    return max(128, min(cap, bt))


def prepare_params(params):
    """One-time packing of the tiny per-layer params (hoisted out of the
    per-call path): a single (N,5) concat + a single (1,N+1) fused fc4 row."""
    f32 = jnp.float32
    w1 = params["w1"].astype(f32)
    pk = jnp.concatenate(
        [w1,
         params["b1"].astype(f32)[:, None],
         params["b2"].astype(f32)[:, None],
         params["b3"].astype(f32)[:, None]], axis=1)                  # (N, 5)
    w4f = jnp.concatenate(
        [(params["w4"][1] - params["w4"][0]).astype(f32)[None, :],
         (params["b4"][1] - params["b4"][0]).astype(f32)[None, None]],
        axis=1)                                                        # (1, N+1)
    return {"w2": params["w2"].astype(f32),
            "w3": params["w3"].astype(f32),
            "pk": pk,
            "w4f": w4f}


def _pallas_forward(xTp, prep, b_tile, n_tiles):
    n = prep["w2"].shape[0]
    Bp = xTp.shape[1]
    return pl.pallas_call(
        net_kernel,
        out_shape=jax.ShapeDtypeStruct((2, Bp), jnp.float32),
        grid_spec=pltpu.PrefetchScalarGridSpec(
            num_scalar_prefetch=0,
            grid=(n_tiles,),
            in_specs=[
                pl.BlockSpec((2, b_tile), lambda i: (0, i)),   # x tile
                pl.BlockSpec((n, n), lambda i: (0, 0)),        # w2 (resident)
                pl.BlockSpec((n, n), lambda i: (0, 0)),        # w3 (resident)
                pl.BlockSpec((n, 5), lambda i: (0, 0)),        # packed params
                pl.BlockSpec((1, n + 1), lambda i: (0, 0)),    # fused fc4 row
            ],
            out_specs=pl.BlockSpec((2, b_tile), lambda i: (0, i)),
        ),
        compiler_params=pltpu.CompilerParams(
            dimension_semantics=("parallel",)),
    )(xTp, prep["w2"], prep["w3"], prep["pk"], prep["w4f"])


@functools.partial(jax.jit, static_argnames=("b_tile_cap",))
def net_forward_T(xT, prep, *, b_tile_cap=4096):
    """Lane-dense API: xT is (2, B) float32, returns (2, B) log-probs.
    Use this end-to-end to avoid any wrapper transposes."""
    B = xT.shape[1]
    b_tile = _choose_b_tile(B, b_tile_cap)
    n_tiles = pl.cdiv(B, b_tile)
    Bp = n_tiles * b_tile
    xTp = jnp.pad(xT.astype(jnp.float32), ((0, 0), (0, Bp - B)))
    outT = _pallas_forward(xTp, prep, b_tile, n_tiles)
    return outT[:, :B]


@functools.partial(jax.jit, static_argnames=("b_tile_cap",))
def net_forward(x, prep, *, b_tile_cap=4096):
    """Batch-major API matching the PyTorch module: x (B, 2) -> (B, 2).
    The pad/transpose around the kernel lives inside this jit so XLA fuses it."""
    return net_forward_T(x.T, prep, b_tile_cap=b_tile_cap).T


def init_params(key, hidden=HIDDEN):
    """Deterministic init mimicking nn.Linear defaults; weights kept (out, in)."""
    def linear(k, fan_in, fan_out):
        kw, kb = jax.random.split(k)
        bound = 1.0 / jnp.sqrt(jnp.float32(fan_in))
        w = jax.random.uniform(kw, (fan_out, fan_in), jnp.float32, -bound, bound)
        b = jax.random.uniform(kb, (fan_out,), jnp.float32, -bound, bound)
        return w, b

    k1, k2, k3, k4 = jax.random.split(key, 4)
    w1, b1 = linear(k1, 2, hidden)
    w2, b2 = linear(k2, hidden, hidden)
    w3, b3 = linear(k3, hidden, hidden)
    w4, b4 = linear(k4, hidden, 2)
    return {"w1": w1, "b1": b1, "w2": w2, "b2": b2,
            "w3": w3, "b3": b3, "w4": w4, "b4": b4}


def reference_forward(x, p):
    hp = jax.lax.Precision.HIGHEST
    h = jnp.maximum(jnp.dot(x, p["w1"].T, precision=hp) + p["b1"], 0.0)
    h = jnp.maximum(jnp.dot(h, p["w2"].T, precision=hp) + p["b2"], 0.0)
    h = jnp.maximum(jnp.dot(h, p["w3"].T, precision=hp) + p["b3"], 0.0)
    logits = jnp.dot(h, p["w4"].T, precision=hp) + p["b4"]
    return jax.nn.log_softmax(logits, axis=-1)


if __name__ == "__main__":
    key = jax.random.PRNGKey(0)
    kx, kx2, kp = jax.random.split(key, 3)

    params = init_params(kp)
    prep = prepare_params(params)   # packed once, reused across calls

    # Batch of 512 -> two 256-wide lane-dense tiles (exercises the parallel grid).
    batch = 512
    x = jax.random.normal(kx, (batch, 2), jnp.float32)
    out = jax.block_until_ready(net_forward(x, prep))
    ref = reference_forward(x, params)
    assert out.shape == (batch, 2)
    # in-kernel MXU dots use default TPU precision vs HIGHEST in the reference
    assert jnp.allclose(out, ref, atol=1e-4, rtol=1e-4), "mismatch vs reference (B=512)"

    # Non-multiple-of-128 batch exercises the padding / slicing path.
    batch2 = 100
    x2 = jax.random.normal(kx2, (batch2, 2), jnp.float32)
    out2 = jax.block_until_ready(net_forward(x2, prep))
    ref2 = reference_forward(x2, params)
    assert out2.shape == (batch2, 2)
    assert jnp.allclose(out2, ref2, atol=1e-4, rtol=1e-4), "mismatch vs reference (B=100)"

    print("KERNEL_OK")
</pallas_src>

<mosaic_0001>
module attributes {stable_mosaic.version = 11 : i64} {
  func.func @net_kernel(%arg0: i32, %arg1: memref<2x256xf32, #tpu.memory_space<vmem>>, %arg2: memref<20x20xf32, #tpu.memory_space<vmem>>, %arg3: memref<20x20xf32, #tpu.memory_space<vmem>>, %arg4: memref<20x5xf32, #tpu.memory_space<vmem>>, %arg5: memref<1x21xf32, #tpu.memory_space<vmem>>, %arg6: memref<2x256xf32, #tpu.memory_space<vmem>>) attributes {dimension_semantics = [#tpu.dimension_semantics<parallel>], iteration_bounds = array<i64: 2>, scalar_prefetch = 0 : i64, scratch_operands = 0 : i64, tpu.core_type = #tpu.core_type<tc>, window_params = [{transform_indices = @transform_0, window_bounds = array<i64: 2, 256>}, {pipeline_mode = #tpu.pipeline_mode<synchronous>, transform_indices = @transform_1, window_bounds = array<i64: 20, 20>}, {pipeline_mode = #tpu.pipeline_mode<synchronous>, transform_indices = @transform_2, window_bounds = array<i64: 20, 20>}, {pipeline_mode = #tpu.pipeline_mode<synchronous>, transform_indices = @transform_3, window_bounds = array<i64: 20, 5>}, {pipeline_mode = #tpu.pipeline_mode<synchronous>, transform_indices = @transform_4, window_bounds = array<i64: 1, 21>}, {transform_indices = @transform_5, window_bounds = array<i64: 2, 256>}]} {
    %c0 = arith.constant 0 : index
    %c0_0 = arith.constant 0 : index
    %0 = vector.load %arg1[%c0, %c0_0] : memref<2x256xf32, #tpu.memory_space<vmem>>, vector<2x256xf32>
    %c0_1 = arith.constant 0 : index
    %c0_2 = arith.constant 0 : index
    %1 = vector.load %arg4[%c0_1, %c0_2] : memref<20x5xf32, #tpu.memory_space<vmem>>, vector<20x5xf32>
    %c0_3 = arith.constant 0 : index
    %c0_4 = arith.constant 0 : index
    %2 = vector.load %arg5[%c0_3, %c0_4] : memref<1x21xf32, #tpu.memory_space<vmem>>, vector<1x21xf32>
    %3 = vector.extract_strided_slice %1 {offsets = [0, 0], sizes = [20, 1], strides = [1, 1]} : vector<20x5xf32> to vector<20x1xf32>
    %4 = vector.extract_strided_slice %1 {offsets = [0, 1], sizes = [20, 1], strides = [1, 1]} : vector<20x5xf32> to vector<20x1xf32>
    %5 = vector.extract_strided_slice %1 {offsets = [0, 2], sizes = [20, 1], strides = [1, 1]} : vector<20x5xf32> to vector<20x1xf32>
    %6 = vector.extract_strided_slice %1 {offsets = [0, 3], sizes = [20, 1], strides = [1, 1]} : vector<20x5xf32> to vector<20x1xf32>
    %7 = vector.extract_strided_slice %1 {offsets = [0, 4], sizes = [20, 1], strides = [1, 1]} : vector<20x5xf32> to vector<20x1xf32>
    %8 = vector.extract_strided_slice %2 {offsets = [0, 0], sizes = [1, 20], strides = [1, 1]} : vector<1x21xf32> to vector<1x20xf32>
    %9 = vector.extract_strided_slice %2 {offsets = [0, 20], sizes = [1, 1], strides = [1, 1]} : vector<1x21xf32> to vector<1x1xf32>
    %10 = vector.extract_strided_slice %0 {offsets = [0, 0], sizes = [1, 256], strides = [1, 1]} : vector<2x256xf32> to vector<1x256xf32>
    %11 = vector.extract_strided_slice %0 {offsets = [1, 0], sizes = [1, 256], strides = [1, 1]} : vector<2x256xf32> to vector<1x256xf32>
    %12 = vector.broadcast %3 : vector<20x1xf32> to vector<20x256xf32>
    %13 = vector.broadcast %10 : vector<1x256xf32> to vector<20x256xf32>
    %14 = arith.mulf %12, %13 : vector<20x256xf32>
    %15 = vector.broadcast %4 : vector<20x1xf32> to vector<20x256xf32>
    %16 = vector.broadcast %11 : vector<1x256xf32> to vector<20x256xf32>
    %17 = arith.mulf %15, %16 : vector<20x256xf32>
    %18 = arith.addf %14, %17 : vector<20x256xf32>
    %19 = vector.broadcast %5 : vector<20x1xf32> to vector<20x256xf32>
    %20 = arith.addf %18, %19 : vector<20x256xf32>
    %cst = arith.constant 0.000000e+00 : f32
    %21 = vector.broadcast %cst : f32 to vector<20x256xf32>
    %22 = arith.maximumf %20, %21 : vector<20x256xf32>
    %c0_5 = arith.constant 0 : index
    %c0_6 = arith.constant 0 : index
    %23 = vector.load %arg2[%c0_5, %c0_6] : memref<20x20xf32, #tpu.memory_space<vmem>>, vector<20x20xf32>
    %cst_7 = arith.constant dense<0.000000e+00> : vector<20x256xf32>
    %24 = tpu.matmul %23, %22, %cst_7 {dimension_numbers = #tpu.dot_dimension_numbers<[1], [0], [0], [1], [0, 0, 1, 1], [], []>} : vector<20x20xf32>, vector<20x256xf32>, vector<20x256xf32> -> vector<20x256xf32>
    %25 = vector.broadcast %6 : vector<20x1xf32> to vector<20x256xf32>
    %26 = arith.addf %24, %25 : vector<20x256xf32>
    %cst_8 = arith.constant 0.000000e+00 : f32
    %27 = vector.broadcast %cst_8 : f32 to vector<20x256xf32>
    %28 = arith.maximumf %26, %27 : vector<20x256xf32>
    %c0_9 = arith.constant 0 : index
    %c0_10 = arith.constant 0 : index
    %29 = vector.load %arg3[%c0_9, %c0_10] : memref<20x20xf32, #tpu.memory_space<vmem>>, vector<20x20xf32>
    %cst_11 = arith.constant dense<0.000000e+00> : vector<20x256xf32>
    %30 = tpu.matmul %29, %28, %cst_11 {dimension_numbers = #tpu.dot_dimension_numbers<[1], [0], [0], [1], [0, 0, 1, 1], [], []>} : vector<20x20xf32>, vector<20x256xf32>, vector<20x256xf32> -> vector<20x256xf32>
    %31 = vector.broadcast %7 : vector<20x1xf32> to vector<20x256xf32>
    %32 = arith.addf %30, %31 : vector<20x256xf32>
    %cst_12 = arith.constant 0.000000e+00 : f32
    %33 = vector.broadcast %cst_12 : f32 to vector<20x256xf32>
    %34 = arith.maximumf %32, %33 : vector<20x256xf32>
    %cst_13 = arith.constant dense<0.000000e+00> : vector<1x256xf32>
    %35 = tpu.matmul %8, %34, %cst_13 {dimension_numbers = #tpu.dot_dimension_numbers<[1], [0], [0], [1], [0, 0, 1, 1], [], []>} : vector<1x20xf32>, vector<20x256xf32>, vector<1x256xf32> -> vector<1x256xf32>
    %36 = vector.broadcast %9 : vector<1x1xf32> to vector<1x256xf32>
    %37 = arith.addf %35, %36 : vector<1x256xf32>
    %cst_14 = arith.constant 0.000000e+00 : f32
    %38 = vector.broadcast %cst_14 : f32 to vector<1x256xf32>
    %39 = arith.maximumf %37, %38 : vector<1x256xf32>
    %40 = math.absf %37 : vector<1x256xf32>
    %cst_15 = arith.constant 0.000000e+00 : f32
    %41 = vector.broadcast %cst_15 : f32 to vector<1x256xf32>
    %42 = arith.subf %41, %40 : vector<1x256xf32>
    %43 = math.exp %42 : vector<1x256xf32>
    %cst_16 = arith.constant 1.000000e+00 : f32
    %44 = vector.broadcast %cst_16 : f32 to vector<1x256xf32>
    %45 = arith.addf %44, %43 : vector<1x256xf32>
    %46 = math.log %45 : vector<1x256xf32>
    %47 = arith.addf %39, %46 : vector<1x256xf32>
    %cst_17 = arith.constant 0.000000e+00 : f32
    %48 = vector.broadcast %cst_17 : f32 to vector<1x256xf32>
    %49 = arith.subf %48, %47 : vector<1x256xf32>
    %c0_18 = arith.constant 0 : index
    %c0_19 = arith.constant 0 : index
    %50 = vector.load %arg6[%c0_18, %c0_19] : memref<2x256xf32, #tpu.memory_space<vmem>>, vector<1x256xf32>
    tpu.vector_store %arg6[%c0_18, %c0_19], %49 {strides = array<i32>} : memref<2x256xf32, #tpu.memory_space<vmem>>, vector<1x256xf32>,
    %51 = arith.subf %37, %47 : vector<1x256xf32>
    %c1 = arith.constant 1 : index
    %c0_20 = arith.constant 0 : index
    %52 = vector.load %arg6[%c1, %c0_20] : memref<2x256xf32, #tpu.memory_space<vmem>>, vector<1x256xf32>
    tpu.vector_store %arg6[%c1, %c0_20], %51 {strides = array<i32>} : memref<2x256xf32, #tpu.memory_space<vmem>>, vector<1x256xf32>,
    return
  }
  func.func @transform_0(%arg0: i32) -> (i32, i32) {
    %c0_i32 = arith.constant 0 : i32
    %c0_i32_0 = arith.constant 0 : i32
    return %c0_i32, %arg0 : i32, i32
  }
  func.func @transform_1(%arg0: i32) -> (i32, i32) {
    %c0_i32 = arith.constant 0 : i32
    %c0_i32_0 = arith.constant 0 : i32
    %c0_i32_1 = arith.constant 0 : i32
    return %c0_i32, %c0_i32_0 : i32, i32
  }
  func.func @transform_2(%arg0: i32) -> (i32, i32) {
    %c0_i32 = arith.constant 0 : i32
    %c0_i32_0 = arith.constant 0 : i32
    %c0_i32_1 = arith.constant 0 : i32
    return %c0_i32, %c0_i32_0 : i32, i32
  }
  func.func @transform_3(%arg0: i32) -> (i32, i32) {
    %c0_i32 = arith.constant 0 : i32
    %c0_i32_0 = arith.constant 0 : i32
    %c0_i32_1 = arith.constant 0 : i32
    return %c0_i32, %c0_i32_0 : i32, i32
  }
  func.func @transform_4(%arg0: i32) -> (i32, i32) {
    %c0_i32 = arith.constant 0 : i32
    %c0_i32_0 = arith.constant 0 : i32
    %c0_i32_1 = arith.constant 0 : i32
    return %c0_i32, %c0_i32_0 : i32, i32
  }
  func.func @transform_5(%arg0: i32) -> (i32, i32) {
    %c0_i32 = arith.constant 0 : i32
    %c0_i32_0 = arith.constant 0 : i32
    return %c0_i32, %arg0 : i32, i32
  }
}

</mosaic_0001>

<bundles_post_ra>
// kernel: net_forward_T.1
= control target key start
LH: loop header
LB: loop body
LE: loop exit
PB: predicated region body
PF: predicated region fallthrough
CT: control target
= control target key end

     0   :  { %10 = vsyncpa [#allocation3], 0  ;;  %s1302_s0 = inlined_call_operand.vmem [shape: f32[2,512], index: 0, kind: input, shape index: {}]   ;;  %s1303_s1 = inlined_call_operand.vmem [shape: f32[20,20], index: 1, kind: input, shape index: {}]   ;;  %s1304_s2 = inlined_call_operand.hbm [shape: f32[20,20], index: 2, kind: input, shape index: {}]   ;;  %s1305_s3 = inlined_call_operand.vmem [shape: f32[20,5], index: 3, kind: input, shape index: {}]   ;;  %s1306_s4 = inlined_call_operand.vmem [shape: f32[1,21], index: 4, kind: input, shape index: {}]   ;;  %s1307_s5 = inlined_call_operand.hbm [shape: f32[2,512], index: 5, kind: output, shape index: {}]  }
   0x1   :  { %11 = vsyncpa [#allocation4], 0 }
   0x2   :  { %13 = vsyncpa [#allocation4 + $0x1], 0  ;;  %s1091_s18 = smov 0   ;;  %s1093_s19 = smov 0  }
   0x3   :  { %s1095_s20 = smov 0   ;;  %s1097_s21 = smov 0  }
   0x4 LB: > { %s1112_s22 = sadd.s32 4294967295, %s1047_s21   ;;  %s831_s23 = sadd.s32 4294967294, %s1047_s21   ;;  %s1047_s21 = sphi %s1097_s21, %s1323_s21   ;;  %s1043_s20 = sphi %s1095_s20, %s1322_s20   ;;  %s1039_s19 = sphi %s1093_s19, %s1321_s19   ;;  %s1035_s18 = sphi %s1091_s18, %s1320_s18  }
   0x5   : > { %s1116_s24 = sadd.s32 1, %s1047_s21   ;;  %s136_s25 = sadd.s32 1, %s1043_s20 }
   0x6   : > { %s133_s26 = ssub.s32 %s1047_s21, %s1116_s24  ;;  %p146_p0 = scmp.ne.s32.totalorder %s1043_s20, %s1039_s19 }
   0x7   : > { %p134_p1 = scmp.eq.s32.totalorder %s133_s26, 0  ;;  %p147_p2 = scmp.eq.s32.totalorder %s1112_s22, 1 }
   0x8   : > { %p152_p3 = scmp.ne.s32.totalorder %s1039_s19, %s1035_s18  ;;  %p153_p4 = scmp.eq.s32.totalorder %s831_s23, 1 }
   0x9   : > { %s1127_s27 = scalar_select %p134_p1, %s1043_s20, %s136_s25  }
   0xa   : > { %p1129_p5 = por %p147_p2, %p146_p0  ;;  %p1133_p6 = por %p153_p4, %p152_p3 }
   0xb   : > { %p832_p7 = scmp.ge.s32.totalorder %s1047_s21, 1  ;;  %p160_p8 = scmp.lt.s32.totalorder %s1047_s21, 3 }
   0xc   : > { %s1311_s28 = scalar_select %p1129_p5, 1, 0 }
   0xd   : > { %s1312_s29 = scalar_select %p1133_p6, 1, 0 }
   0xe   : > { %p1308_p9 = scmp.eq.s32.totalorder %s1112_s22, 0  ;;  %p1140_p10 = pnand %p832_p7, %p160_p8 }
   0xf   : > { %s1049_s6 = smov [#allocation2]   ;;  %s953_s11 = scalar_lea.hbm %s1304_s2, 384 }
  0x10   : > { %s1313_s30 = scalar_select %p1140_p10, 1, 0 }
  0x11   : > { %s175_s7 = sshll.u32 %s1049_s6, 4  ;;  %p878_p11 = pneg %p1140_p10  ;;  %s176_s7 = int_to_ptr.vmem [resolvable:$true] %s175_s7 }
  0x12   : > { %p954_p13 = scmp.ne.s32.totalorder %s1304_s2, %s953_s11  ;;  %p960_p3 = scmp.lt.u32.totalorder %s953_s11, %s1304_s2 }
  0x13   : > { %p1148_p12 = pnand %p1308_p9, %p878_p11 }
  0x15   : > { %p955_p0 = pneg %p1148_p12 }
  0x17   : > { %p956_p1 = pnand %p955_p0, %p954_p13 }
  0x19   : > { %p957_p2 = pneg %p956_p1 }
  0x1b   : > { %p962_p4 = pnand %p960_p3, %p957_p2 }
  0x1d   : > { %965 = shalt.err (!%p962_p4)
}
  0x1e   : > { %s966_s16 = scalar_lea.vmem %s176_s7, 384  ;;  %p974_p9 = scmp.lt.s32.totalorder %s176_s7, %s176_s7 }
  0x1f   : > { %p967_p7 = scmp.ne.s32.totalorder %s176_s7, %s966_s16  ;;  %p975_p6 = scmp.lt.s32.totalorder %s966_s16, %s966_s16 }
  0x21   : > { %p969_p8 = pnand %p967_p7, %p955_p0  ;;  %p976_p5 = por %p975_p6, %p974_p9 }
  0x23   : > { %p970_p11 = pneg %p969_p8 }
  0x25   : > { %p977_p10 = pnand %p976_p5, %p970_p11 }
  0x27   : > { %980 = shalt.err (!%p977_p10)
}
  0x28   : > { %s1050_s17 = smov 128   ;;  %s1051_s23 = smov 8  }
  0x29   : > { %881 = dma.hbm_to_vmem [thread:$0]  (!%p1148_p12), %s1304_s2, 384, %s176_s7, [#allocation3], %s1050_s17, %s1050_s17, %s1051_s23  }
  0x2a   : > { %p1315_p13 = scmp.ne.s32.totalorder %s1313_s30, 0 }
  0x2b   : > { %p1316_p1 = scmp.eq.s32.totalorder (!%p1315_p13), %s1112_s22, 0 }
  0x2c   : > { %206 = sbr.rel (%p1315_p13) target bundleno = 936 (0x3a8), region = 40 }
  0x33   : > { %1026 = dma.done.wait (%p1316_p1), [#allocation3], 384   ;;  %p1317_p0 = pmov %p1316_p1 }
  0x34   : > { %v1052_v0 = vmov 1   ;;  %v1053_v1 = vmov 0   ;;  %v1177_v2 = vld [vmem:[%s1305_s3] sm:$0xff]  ;;  %v1184_v3 = vld [vmem:[%s1305_s3 + $0x8] sm:$0xff]  ;;  %v1054_v4 = vmov 2   ;;  %v1055_v6 = vmov 0.0  }
  0x35   : > { %1028 = vsyncadd (%p1317_p0), [#allocation3], 4294966912  ;;  %933 = vset.pattern.permute.xlu1 %v1052_v0  ;;  %932 = vset.pattern.permute.xlu0 %v1053_v1  ;;  %v1193_v5 = vld [vmem:[%s1305_s3 + $0x10] sm:$0xf]  ;;  %v1056_v7 = vmov 3   ;;  %s838_s11 = sshll.u32 %s1112_s22, 1  ;;  %v262_v8 = vlaneseq }
  0x36   : > { %287 = vperm.xlu1 %933, %v1177_v2   ;;  %248 = vperm.xlu0 %932, %v1177_v2   ;;  %p235_p5 = scmp.lt.s32.totalorder %s838_s11, 3  ;;  %vm377_vm0 = vcmask 1043456   ;;  %vm367_vm1 = vcmask 162816   ;;  %s231_s7 = sand.u32 1, %s1039_s19  }
  0x37   : > { %448 = vmatprep.mubr.f32.mxu0 %v1055_v6  ;;  %567 = vmatprep.mubr.f32.mxu1 %v1055_v6  ;;  %v1205_v9 = vshrl.u32 %v262_v8, 7  ;;  %s837_s8 = sshll.u32 %s231_s7, 2  ;;  %s859_s10 = sshll.u32 %s1112_s22, 6  ;;  %vm720_vm2 = vcmp.lt.s32.totalorder %v262_v8, 256 }
  0x38   : > { %s1325_s11 = smov (!%p235_p5, %s838_s11), 3  ;;  %s746_s22 = scalar_lea.sflag [#allocation4], %s231_s7 }
  0x39   : > { %s839_s12 = sshll.u32 %s1325_s11, 1  ;;  %v300_v10 = vsub.s32 1, %v1205_v9  ;;  %v304_v11 = vsub.s32 3, %v1205_v9  ;;  %v1213_v12 = vsub.s32 0, %v1205_v9  ;;  %v268_v13 = vsub.s32 2, %v1205_v9  ;;  %s233_s11 = scalar_lea.vmem [#allocation5], %s837_s8 }
  0x3a   : > { %291 = vperm.xlu1 %933, %v1184_v3   ;;  %253 = vperm.xlu0 %932, %v1184_v3   ;;  %s238_s15 = scalar_lea.vmem %s1302_s0, %s839_s12  ;;  %s760_s12 = sshll.u32 %s233_s11, 4  ;;  %s1262_s12 = int_to_ptr.vmem [resolvable:$true] %s760_s12 }
  0x3b   : > { %v241_v14 = vld [vmem:[%s238_s15] sm:$0xf]  ;;  %s1260_s15 = scalar_lea.hbm %s1307_s5, %s859_s10  ;;  %s981_s16 = scalar_lea.vmem %s1262_s12, 64 }
  0x3c   : > { %v301_v15 = vrot.slane %v241_v14, %v300_v10  ;;  %v305_v16 = vrot.slane %v241_v14, %v304_v11  ;;  %v265_v17 = vrot.slane %v241_v14, %v1213_v12  ;;  %v269_v18 = vrot.slane %v241_v14, %v268_v13  ;;  %p982_p6 = scmp.ne.s32.totalorder %s1262_s12, %s981_s16  ;;  %p1318_p9 = scmp.ne.s32.totalorder %s1311_s28, 0 }
  0x3d   : > { %s1060_s17 = smov [#allocation5]  }
  0x3e   : > { %935 = vset.pattern.permute.xlu1 %v1054_v4  ;;  %934 = vset.pattern.permute.xlu0 %v1054_v4  ;;  %v311_v20 = vrot.slane %v301_v15, %v300_v10  ;;  %v315_v21 = vrot.slane %v305_v16, %v300_v10  ;;  %v275_v23 = vrot.slane %v265_v17, %v1213_v12  ;;  %p983_p10 = pnand %p982_p6, %p1318_p9  ;;  %s985_s23 = sshll.u32 %s1060_s17, 4  ;;  %s986_s23 = int_to_ptr.vmem [resolvable:$false] %s985_s23 }
  0x3f   : > { %333 = vperm.xlu1 %935, %v1184_v3   ;;  %329 = vperm.xlu0 %934, %v1177_v2   ;;  %v279_v24 = vrot.slane %v269_v18, %v1213_v12  ;;  %s987_s25 = scalar_lea.vmem %s986_s23, 128  ;;  %p988_p2 = scmp.lt.s32.totalorder %s1262_s12, %s986_s23 }
  0x40   : > { %p984_p12 = pneg %p983_p10  ;;  %p989_p3 = scmp.lt.s32.totalorder %s987_s25, %s981_s16 }
  0x42   : > { %p990_p4 = por %p989_p3, %p988_p2 }
  0x43   : > { %936 = vset.pattern.permute.xlu1 %v1053_v1  ;;  %937 = vset.pattern.permute.xlu0 %v1052_v0  ;;  %v352_v0 = vld [vmem:[%s1303_s1] sm:$0xff]  ;;  %v353_v1 = vld [vmem:[%s1303_s1 + $0x8] sm:$0xff] }
  0x44   : > { %258 = vperm.xlu1 %936, %v1193_v5   ;;  %295 = vperm.xlu0 %937, %v1193_v5   ;;  %p991_p7 = pnand %p990_p4, %p984_p12 }
  0x48   : > { %938 = vset.pattern.permute.xlu1 %v1054_v4  ;;  %940 = vset.pattern.permute.xlu0 %v1056_v7  ;;  %v354_v4 = vld [vmem:[%s1303_s1 + $0x10] sm:$0xf] }
  0x49   : > { %337 = vperm.xlu1 %938, %v1193_v5   ;;  %360 = vperm.xlu0 %940, %v1184_v3  }
  0x4d   : > { %939 = vset.pattern.permute.xlu1 %v1056_v7  ;;  %v1057_v7 = vmov 4  }
  0x4e   : > { %356 = vperm.xlu1 %939, %v1177_v2   ;;  %942 = vset.pattern.permute.xlu0 %v1057_v7 }
  0x4f   : > { %481 = vperm.xlu0 %942, %v1184_v3  }
  0x52   : > { %364 = vperm.xlu1 %939, %v1193_v5  }
  0x56   : > { %941 = vset.pattern.permute.xlu1 %v1057_v7 }
  0x57   : > { %477 = vperm.xlu1 %941, %v1177_v2  }
  0x5b   : > { %485 = vperm.xlu1 %941, %v1193_v5  }
  0xb5   : > { %v288_v19 = vpop.permute.xlu1 %287  ;;  %v249_v22 = vpop.permute.xlu0 %248 }
  0xb6   : > { %v316_v25 = vmul.f32 %v311_v20, %v288_v19  ;;  %v317_v26 = vmul.f32 %v315_v21, %v288_v19  ;;  %v280_v27 = vmul.f32 %v275_v23, %v249_v22  ;;  %v281_v28 = vmul.f32 %v279_v24, %v249_v22 }
  0xb8   : > { %v322_v37 = vadd.f32 %v316_v25, %v280_v27  ;;  %v323_v38 = vadd.f32 %v317_v26, %v281_v28 }
  0xb9   : > { %v292_v29 = vpop.permute.xlu1 %291  ;;  %v254_v30 = vpop.permute.xlu0 %253 }
  0xba   : > { %v318_v31 = vmul.f32 %v311_v20, %v292_v29  ;;  %v319_v32 = vmul.f32 %v315_v21, %v292_v29  ;;  %v282_v33 = vmul.f32 %v275_v23, %v254_v30  ;;  %v283_v34 = vmul.f32 %v279_v24, %v254_v30 }
  0xbc   : > { %v324_v35 = vadd.f32 %v318_v31, %v282_v33  ;;  %v325_v36 = vadd.f32 %v319_v32, %v283_v34  ;;  %v473_v31 = vld [vmem:[#allocation2] sm:$0xff]  ;;  %v474_v32 = vld [vmem:[#allocation2 + $0x8] sm:$0xff]  ;;  %v475_v33 = vld [vmem:[#allocation2 + $0x10] sm:$0xf] }
  0xbd   : > { %v245_v34 = vld [vmem:[%s1306_s4] sm:$0x1] }
  0xbe   : > { %v334_v39 = vpop.permute.xlu1 %333  ;;  %v330_v40 = vpop.permute.xlu0 %329 }
  0xbf   : > { %v342_v41 = vadd.f32 %v334_v39, %v324_v35  ;;  %v343_v42 = vadd.f32 %v334_v39, %v325_v36  ;;  %v340_v43 = vadd.f32 %v330_v40, %v322_v37  ;;  %v341_v44 = vadd.f32 %v330_v40, %v323_v38 }
  0xc0   : > { %v1058_v35 = vmov 20  }
  0xc1   : > { %v348_v45 = vmax.f32 %v342_v41, 0.0  ;;  %v346_v46 = vmax.f32 %v340_v43, 0.0  ;;  %v347_v47 = vmax.f32 %v341_v44, 0.0  ;;  %v349_v48 = vmax.f32 %v343_v42, 0.0  ;;  %943 = vset.pattern.permute.xlu1 %v1058_v35  ;;  %944 = vset.pattern.permute.xlu0 %v1058_v35 }
  0xc2   : > { %594 = vperm.xlu1 %943, %v245_v34  }
  0xc3   : > { %v259_v49 = vpop.permute.xlu1 %258  ;;  %v296_v50 = vpop.permute.xlu0 %295  ;;  %v860_v51 = vpack.c.bf16 %v349_v48, %v347_v47  ;;  %v862_v52 = vpack.c.bf16 %v348_v45, %v346_v46 }
  0xc4   : > { %v284_v53 = vmul.f32 %v275_v23, %v259_v49  ;;  %v285_v54 = vmul.f32 %v279_v24, %v259_v49  ;;  %v320_v55 = vmul.f32 %v311_v20, %v296_v50  ;;  %v321_v56 = vmul.f32 %v315_v21, %v296_v50 }
  0xc5   : > { %861 = vmatprep.subr.bf16.mxu0 %v860_v51 }
  0xc6   : > { %863 = vmatpush1.bf16.msra.mxu0 %v862_v52  ;;  %v326_v57 = vadd.f32 %v320_v55, %v284_v53  ;;  %v327_v58 = vadd.f32 %v321_v56, %v285_v54 }
  0xc8   : > { %v338_v59 = vpop.permute.xlu1 %337  ;;  %v361_v14 = vpop.permute.xlu0 %360 }
  0xc9   : > { %v344_v60 = vadd.f32 %v338_v59, %v326_v57  ;;  %v345_v61 = vadd.f32 %v338_v59, %v327_v58 }
  0xcb   : > { %v350_v62 = vmax.f32 %v344_v60, 0.0  ;;  %v351_v63 = vmax.f32 %v345_v61, 0.0 }
  0xcd   : > { %840 = vmatprep.subr.msk.mxu0 %vm377_vm0, %v351_v63  ;;  %v357_v10 = vpop.permute.xlu1 %356 }
  0xce   : > { %841 = vmatpush1.msk.msra.mxu0 %vm377_vm0, %v350_v62  ;;  %v482_v39 = vpop.permute.xlu0 %481 }
  0xcf   : > { %842 = vmatmul.mubr.msk.f32.vlgmr.msra.gmra.mrb[0].mxu0 %vm367_vm1, %v352_v0 }
  0xd0   : > { %454 = vmatprep.mubr.f32.mxu0 %v1055_v6 }
  0xd1   : > { %v365_v2 = vpop.permute.xlu1 %364 }
  0xd3   : > { %843 = vmatmul.mubr.msk.f32.gmra.mrb[2].mxu0 %vm367_vm1, %v353_v1 }
  0xd4   : > { %460 = vmatprep.mubr.f32.mxu0 %v1055_v6 }
  0xd6   : > { %v478_v36 = vpop.permute.xlu1 %477 }
  0xd7   : > { %844 = vmatmul.mubr.msk.f32.gmra.mrb[4].mxu0 %vm367_vm1, %v354_v4 }
  0xd8   : > { %673 = vmatprep.mubr.f32.mxu0 %v1055_v6 }
  0xda   : > { %v486_v51 = vpop.permute.xlu1 %485 }
 0x141   : > { %v595_v58 = vpop.permute.xlu1 %594 }
 0x142   : > { %v600_v59 = vrot.slane %v595_v58, %v1213_v12  ;;  %v1059_v12 = vmov 1966171168  }
 0x1a2   : > { %v450_v11 = vpop.f32.mrb[0].mxu0 }
 0x1a3   : > { %v452_v13 = vpop.f32.mrb[1].mxu0  ;;  %v451_v15 = vadd.f32 %v450_v11, %v357_v10 }
 0x1a4   : > { %v453_v16 = vadd.f32 %v452_v13, %v357_v10 }
 0x1a5   : > { %v467_v21 = vmax.f32 %v451_v15, 0.0 }
 0x1a6   : > { %v456_v17 = vpop.f32.mrb[2].mxu0  ;;  %v468_v23 = vmax.f32 %v453_v16, 0.0 }
 0x1a7   : > { %v457_v18 = vadd.f32 %v456_v17, %v361_v14  ;;  %v458_v19 = vpop.f32.mrb[3].mxu0  ;;  %v704_v17 = vunpack.c.l.s4 %v1059_v12 }
 0x1a8   : > { %v459_v20 = vadd.f32 %v458_v19, %v361_v14 }
 0x1a9   : > { %v469_v22 = vmax.f32 %v457_v18, 0.0 }
 0x1aa   : > { %v470_v24 = vmax.f32 %v459_v20, 0.0  ;;  %v462_v25 = vpop.f32.mrb[4].mxu0 }
 0x1ab   : > { %v464_v26 = vpop.f32.mrb[5].mxu0  ;;  %v866_v3 = vpack.c.bf16 %v469_v22, %v467_v21  ;;  %v463_v28 = vadd.f32 %v462_v25, %v365_v2 }
 0x1ac   : > { %v465_v27 = vadd.f32 %v464_v26, %v365_v2  ;;  %v864_v5 = vpack.c.bf16 %v470_v24, %v468_v23  ;;  %v705_v24 = vunpack.c.0.s8 %v704_v17 }
 0x1ad   : > { %v471_v30 = vmax.f32 %v463_v28, 0.0 }
 0x1ae   : > { %v472_v29 = vmax.f32 %v465_v27, 0.0  ;;  %865 = vmatprep.subr.bf16.mxu1 %v864_v5  ;;  %v708_v5 = vsub.s32 %v705_v24, %v1205_v9 }
 0x1af   : > { %867 = vmatpush1.bf16.msra.mxu1 %v866_v3 }
 0x1b0   : > { %845 = vmatprep.subr.msk.mxu1 %vm377_vm0, %v472_v29 }
 0x1b3   : > { %846 = vmatpush1.msk.msra.mxu1 %vm377_vm0, %v471_v30 }
 0x1b4   : > { %847 = vmatmul.mubr.msk.f32.vlgmr.msra.gmra.mrb[0].mxu1 %vm367_vm1, %v473_v31 }
 0x1b5   : > { %573 = vmatprep.mubr.f32.mxu1 %v1055_v6 }
 0x1b8   : > { %848 = vmatmul.mubr.msk.f32.gmra.mrb[2].mxu1 %vm367_vm1, %v474_v32 }
 0x1b9   : > { %579 = vmatprep.mubr.f32.mxu1 %v1055_v6 }
 0x1bc   : > { %849 = vmatmul.mubr.msk.f32.gmra.mrb[4].mxu1 %vm367_vm1, %v475_v33 }
 0x287   : > { %v569_v37 = vpop.f32.mrb[0].mxu1 }
 0x288   : > { %v571_v38 = vpop.f32.mrb[1].mxu1  ;;  %v570_v40 = vadd.f32 %v569_v37, %v478_v36 }
 0x289   : > { %v572_v41 = vadd.f32 %v571_v38, %v478_v36 }
 0x28a   : > { %v586_v45 = vmax.f32 %v570_v40, 0.0 }
 0x28b   : > { %v575_v42 = vpop.f32.mrb[2].mxu1  ;;  %v587_v47 = vmax.f32 %v572_v41, 0.0 }
 0x28c   : > { %v576_v43 = vadd.f32 %v575_v42, %v482_v39  ;;  %v577_v6 = vpop.f32.mrb[3].mxu1 }
 0x28d   : > { %v578_v44 = vadd.f32 %v577_v6, %v482_v39 }
 0x28e   : > { %v588_v46 = vmax.f32 %v576_v43, 0.0 }
 0x28f   : > { %v589_v48 = vmax.f32 %v578_v44, 0.0  ;;  %v581_v49 = vpop.f32.mrb[4].mxu1 }
 0x290   : > { %v870_v50 = vpack.c.bf16 %v588_v46, %v586_v45  ;;  %v583_v52 = vpop.f32.mrb[5].mxu1  ;;  %v582_v55 = vadd.f32 %v581_v49, %v486_v51 }
 0x291   : > { %v868_v53 = vpack.c.bf16 %v589_v48, %v587_v47  ;;  %v584_v54 = vadd.f32 %v583_v52, %v486_v51 }
 0x292   : > { %v590_v57 = vmax.f32 %v582_v55, 0.0 }
 0x293   : > { %v591_v56 = vmax.f32 %v584_v54, 0.0  ;;  %869 = vmatprep.subr.bf16.mxu0 %v868_v53 }
 0x294   : > { %871 = vmatpush1.bf16.msra.mxu0 %v870_v50 }
 0x295   : > { %850 = vmatprep.subr.msk.mxu0 %vm377_vm0, %v591_v56 }
 0x298   : > { %851 = vmatpush1.msk.msra.mxu0 %vm377_vm0, %v590_v57 }
 0x299   : > { %852 = vmatmul.mubr.msk.f32.vlgmr.msra.gmra.mrb[6].mxu0 %vm367_vm1, %v245_v34 }
 0x36c   : > { %v675_v60 = vpop.f32.mrb[6].mxu0 }
 0x36d   : > { %v676_v61 = vadd.f32 %v675_v60, %v600_v59  ;;  %v677_v62 = vpop.f32.mrb[7].mxu0 }
 0x36e   : > { %v678_v63 = vadd.f32 %v677_v62, %v600_v59 }
 0x36f   : > { %v682_v0 = vand.u32 2147483647, %v676_v61  ;;  %v680_v20 = vmax.f32 %v676_v61, 0.0 }
 0x370   : > { %v683_v1 = vand.u32 2147483647, %v678_v63  ;;  %v681_v22 = vmax.f32 %v678_v63, 0.0 }
 0x371   : > { %v684_v4 = vsub.f32 0.0, %v682_v0 }
 0x372   : > { %v685_v7 = vsub.f32 0.0, %v683_v1 }
 0x373   : > { %v686_v10 = vmul.f32 1.442695, %v684_v4 }
 0x374   : > { %v688_v11 = vmul.f32 1.442695, %v685_v7 }
 0x375   : > { %945 = vpow2.f32 %v686_v10 }
 0x376   : > { %947 = vpow2.f32 %v688_v11 }
 0x37f   : > { %v946_v13 = vpop.eup %945 }
 0x380   : > { %v948_v14 = vpop.eup %947  ;;  %v690_v15 = vadd.f32 1.0, %v946_v13 }
 0x381   : > { %v691_v16 = vadd.f32 1.0, %v948_v14 }
 0x382   : > { %949 = vlog2.f32 %v690_v15 }
 0x383   : > { %951 = vlog2.f32 %v691_v16 }
 0x38c   : > { %v950_v18 = vpop.eup %949 }
 0x38d   : > { %v952_v19 = vpop.eup %951  ;;  %v693_v21 = vmul.f32 0.6931472, %v950_v18 }
 0x38e   : > { %v695_v23 = vmul.f32 0.6931472, %v952_v19 }
 0x38f   : > { %v696_v25 = vadd.f32 %v693_v21, %v680_v20 }
 0x390   : > { %v697_v2 = vadd.f32 %v695_v23, %v681_v22 }
 0x391   : > { %v698_v26 = vsub.f32 0.0, %v696_v25  ;;  %v723_v3 = vsub.f32 %v676_v61, %v696_v25 }
 0x392   : > { %v699_v27 = vsub.f32 0.0, %v697_v2  ;;  %v724_v28 = vsub.f32 %v678_v63, %v697_v2 }
 0x394   : > { %v702_v29 = vcombine.low %v698_v26, %v699_v27  ;;  %v727_v30 = vcombine.low %v723_v3, %v724_v28 }
 0x396   : > { %v709_v31 = vrot.slane %v702_v29, %v708_v5  ;;  %v734_v32 = vrot.slane %v727_v30, %v708_v5 }
 0x398   : > { %v716_v33 = vrot.slane %v709_v31, %v708_v5  ;;  %v741_v34 = vrot.slane %v734_v32, %v708_v5 }
 0x39a   : > { %722 = vst.msk [vmem:[%s233_s11] ss:$2 sm:$0x3] %vm720_vm2, %v716_v33  ;;  %853 = vst.msk [vmem:[%s233_s11 + $0x1] ss:$2 sm:$0x3] %vm720_vm2, %v741_v34 }
 0x39b   : > { %994 = shalt.err (!%p991_p7)
}
 0x39c   : > { %s995_s26 = scalar_lea.hbm %s1260_s15, 64  ;;  %s999_s30 = scalar_lea.hbm %s1307_s5, 128 }
 0x39d   : > { %p996_p8 = scmp.ne.s32.totalorder %s1260_s15, %s995_s26  ;;  %p1000_p1 = scmp.lt.u32.totalorder %s1260_s15, %s1307_s5 }
 0x39e   : > { %p1001_p0 = scmp.lt.u32.totalorder %s999_s30, %s995_s26  ;;  %p1003_p6 = scmp.lt.u32.totalorder %s995_s26, %s1260_s15 }
 0x39f   : > { %p997_p11 = pnand %p996_p8, %p1318_p9 }
 0x3a0   : > { %p1002_p5 = por %p1001_p0, %p1000_p1 }
 0x3a1   : > { %p998_p13 = pneg %p997_p11 }
 0x3a2   : > { %p1004_p10 = por %p1003_p6, %p1002_p5 }
 0x3a4   : > { %p1005_p12 = pnand %p1004_p10, %p998_p13 }
 0x3a6   : > { %1008 = shalt.err (!%p1005_p12)
}
 0x3a7   : > { %876 = dma.vmem_to_hbm [thread:$0]  (%p1318_p9), %s1262_s12, 64, %s1260_s15, %s746_s22  }
 0x3a8 PF: > { %p888_p2 = scmp.ge.s32.totalorder %s1047_s21, 2  ;;  %s772_s10 = sand.u32 1, %s1035_s18  }
 0x3a9   : > { %p1319_p3 = scmp.ne.s32.totalorder %s1312_s29, 0  ;;  %s773_s11 = scalar_lea.sflag [#allocation4], %s772_s10 }
 0x3ab   : > { %p883_p4 = pnand %p888_p2, %p1319_p3 }
 0x3ad   : > { %1030 = dma.done.wait (!%p883_p4), %s773_s11, 64  }
 0x3ae   : > { %1032 = vsyncadd (!%p883_p4), %s773_s11, 4294967232  ;;  %p16_p7 = scmp.ge.s32.totalorder %s1116_s24, 4   ;;  %s1320_s18 = smov %s1039_s19 }
 0x3af   : > { %s1321_s19 = smov %s1043_s20  ;;  %s1322_s20 = smov %s1127_s27 }
 0x3b0   : > { %s1323_s21 = smov %s1116_s24  ;;  %18 = sbr.rel (!%p16_p7) target bundleno = 4 (0x4), region = 81 }
 0x3b7   :  { %778 = vsyncpa [#allocation3], 1 }
 0x3b8   :  { %780 = vsyncpa [#allocation3 + $0x1], 1 }
 0x3b9   :  { %781 = vsyncpa [#allocation4], 1 }
 0x3ba   :  { %783 = vsyncpa [#allocation4 + $0x1], 1 }

</bundles_post_ra>
